<compile_context>
chip_gen: v5e
topology: v5e:2x2
jax: 0.10.0
libtpu: 0.0.40
codegen_flags: <defaults>
</compile_context>

<pallas_src>
import functools

import jax
import jax.numpy as jnp
from jax.experimental import pallas as pl
from jax.experimental.pallas import tpu as pltpu

LN_EPS = 1e-5  # torch.nn.LayerNorm default


def _layernorm(h, gamma, beta):
    # f32 math, biased variance, eps=1e-5 -> matches torch.nn.LayerNorm.
    mu = jnp.mean(h, axis=-1, keepdims=True)
    var = jnp.mean((h - mu) ** 2, axis=-1, keepdims=True)
    return (h - mu) * jax.lax.rsqrt(var + LN_EPS) * gamma + beta


def _transformer_block_kernel(
    xq_ref, xkv_ref,
    wq_ref, bq_ref, wkv_ref, bkv_ref, wo_ref, bo_ref,
    g1_ref, be1_ref,
    w1_ref, b1_ref, w2_ref, b2_ref,
    g2_ref, be2_ref,
    o_ref,
    *, num_heads, head_size, ffn_chunk,
):
    nh, hd = num_heads, head_size
    xq = xq_ref[0]                         # (tq, H) f32 : this grid step's query rows
    xkv = xkv_ref[0]                       # (S,  H) f32 : full sequence for K/V
    tq, H = xq.shape

    # --- fused, lane-dense projections (bf16 MXU, f32 accumulation) ---
    # 1/sqrt(head_size) is already folded into wq / bq in the wrapper.
    q_all = (jnp.dot(xq.astype(jnp.bfloat16), wq_ref[...],
                     preferred_element_type=jnp.float32)
             + bq_ref[...]).astype(jnp.bfloat16)                    # (tq, nh*hd)
    kv_all = (jnp.dot(xkv.astype(jnp.bfloat16), wkv_ref[...],
                      preferred_element_type=jnp.float32)
              + bkv_ref[...]).astype(jnp.bfloat16)                  # (S, 2*nh*hd)

    # --- per-head attention on 2D tiles (heads = contiguous hd-wide lane groups) ---
    ctx_heads = []
    for h in range(nh):
        q_h = q_all[:, h * hd:(h + 1) * hd]                         # (tq, hd)
        k_h = kv_all[:, h * hd:(h + 1) * hd]                        # (S, hd)
        v_h = kv_all[:, nh * hd + h * hd: nh * hd + (h + 1) * hd]   # (S, hd)
        s = jnp.dot(q_h, k_h.T, preferred_element_type=jnp.float32)  # (tq, S) f32
        m = jnp.max(s, axis=-1, keepdims=True)
        p = jnp.exp(s - m)
        p = p * pl.reciprocal(jnp.sum(p, axis=-1, keepdims=True), approx=True)
        ctx_heads.append(jnp.dot(p.astype(jnp.bfloat16), v_h,
                                 preferred_element_type=jnp.float32))  # (tq, hd)

    # --- single output projection over all heads: (tq, nh*hd) @ (nh*hd, H) ---
    ctx = jnp.concatenate(ctx_heads, axis=-1).astype(jnp.bfloat16)     # (tq, nh*hd)
    attn = jnp.dot(ctx, wo_ref[...],
                   preferred_element_type=jnp.float32) + bo_ref[...]   # (tq, H)

    # --- residual + LayerNorm1 (f32) ---
    y = _layernorm(xq + attn, g1_ref[...], be1_ref[...])

    # --- MLP (Linear -> ReLU -> Linear); FFN dim chunked only when large ---
    y_b = y.astype(jnp.bfloat16)
    ffn = w1_ref.shape[1]
    num_chunks = ffn // ffn_chunk
    if num_chunks == 1:
        h1 = jnp.dot(y_b, w1_ref[...],
                     preferred_element_type=jnp.float32) + b1_ref[...]
        h1 = jnp.maximum(h1, 0.0).astype(jnp.bfloat16)
        h2 = jnp.dot(h1, w2_ref[...],
                     preferred_element_type=jnp.float32) + b2_ref[...]
    else:
        def body(c, acc):
            c0 = pl.multiple_of(c * ffn_chunk, ffn_chunk)
            t = jnp.dot(y_b, w1_ref[:, pl.ds(c0, ffn_chunk)],
                        preferred_element_type=jnp.float32) + b1_ref[:, pl.ds(c0, ffn_chunk)]
            t = jnp.maximum(t, 0.0).astype(jnp.bfloat16)
            return acc + jnp.dot(t, w2_ref[pl.ds(c0, ffn_chunk), :],
                                 preferred_element_type=jnp.float32)
        acc = jax.lax.fori_loop(0, num_chunks, body,
                                jnp.zeros((tq, H), jnp.float32), unroll=True)
        h2 = acc + b2_ref[...]

    # --- residual + LayerNorm2 (f32) ---
    out = _layernorm(y + h2, g2_ref[...], be2_ref[...])
    o_ref[0] = out.astype(o_ref.dtype)


def transformer_block(x, params, *, num_heads, head_size):
    """x: (B, S, H) float32. params: dict of f32 weights (see init_params)."""
    B, S, H = x.shape
    nh, hd = num_heads, head_size
    assert nh * hd == H, "residual add requires num_heads * head_size == hidden"

    bf16 = jnp.bfloat16
    scale = 1.0 / (head_size ** 0.5)

    # Weight prep (plain JAX, done once outside the kernel):
    #   * scale folded into W_q / b_q
    #   * K and V weights fused into one lane-dense (H, 2*nh*hd) matrix
    wq = (params["wq"] * scale).astype(bf16)                              # (H, nh*hd)
    bq = params["bq"] * scale                                             # (1, nh*hd) f32
    wkv = jnp.concatenate([params["wk"], params["wv"]], axis=1).astype(bf16)  # (H, 2*nh*hd)
    bkv = jnp.concatenate([params["bk"], params["bv"]], axis=1)           # (1, 2*nh*hd) f32
    wo = params["wo"].astype(bf16)                                        # (nh*hd, H)
    w1 = params["w1"].astype(bf16)                                        # (H, 4H)
    w2 = params["w2"].astype(bf16)                                        # (4H, H)

    plist = [
        wq, bq, wkv, bkv, wo, params["bo"],
        params["ln1_g"], params["ln1_b"],
        w1, params["b1"], w2, params["b2"],
        params["ln2_g"], params["ln2_b"],
    ]

    # Sequence tile (query rows per grid step); full S stays resident for K/V.
    if S <= 512:
        tq = S
    else:
        tq = S
        for cand in (512, 256, 128):
            if S % cand == 0:
                tq = cand
                break
    n_q = S // tq

    ffn = w1.shape[1]
    ffn_chunk = 2048 if (ffn > 2048 and ffn % 2048 == 0) else ffn

    def full_spec(shape):
        ndim = len(shape)
        return pl.BlockSpec(shape, lambda b, i, _n=ndim: (0,) * _n)

    kernel = functools.partial(
        _transformer_block_kernel,
        num_heads=num_heads, head_size=head_size, ffn_chunk=ffn_chunk)

    # VMEM budget: 2x (pipeline buffering) for weights + activation blocks, plus
    # the major in-kernel intermediates, clamped to a range safe on v5e/v6e/v7x.
    def nbytes(a):
        return a.size * a.dtype.itemsize
    weight_bytes = sum(nbytes(p) for p in plist)
    act_bytes = (2 * tq * H + S * H) * 4                      # xq block, out block, xkv block
    inter_bytes = (
        tq * H * 4 + 2 * S * H * 4                            # q_all, kv_all (counted at f32)
        + 2 * nh * tq * S * 4                                 # per-head scores + softmax temps
        + tq * H * 4                                          # ctx
        + tq * ffn_chunk * 4                                  # h1 chunk
        + 4 * tq * H * 4)                                     # y, h2, residuals, out
    vmem_limit = 2 * weight_bytes + 2 * act_bytes + inter_bytes + (4 << 20)
    vmem_limit = int(min(max(vmem_limit, 16 << 20), 56 << 20))

    return pl.pallas_call(
        kernel,
        out_shape=jax.ShapeDtypeStruct((B, S, H), jnp.float32),
        grid_spec=pltpu.PrefetchScalarGridSpec(
            num_scalar_prefetch=0,
            grid=(B, n_q),
            in_specs=[pl.BlockSpec((1, tq, H), lambda b, i: (b, i, 0)),   # query rows tile
                      pl.BlockSpec((1, S, H), lambda b, i: (b, 0, 0))]    # full seq for K/V
                     + [full_spec(p.shape) for p in plist],
            out_specs=pl.BlockSpec((1, tq, H), lambda b, i: (b, i, 0)),
        ),
        compiler_params=pltpu.CompilerParams(
            dimension_semantics=("parallel", "parallel"),
            vmem_limit_bytes=vmem_limit),
    )(x, x, *plist)


def init_params(key, hidden_size, head_size, num_heads):
    """Deterministic synthetic parameters (PyTorch Linear weights stored transposed)."""
    nh = num_heads * head_size
    ks = jax.random.split(key, 12)
    std = 0.02
    return {
        "wq": jax.random.normal(ks[0], (hidden_size, nh), jnp.float32) * std,
        "bq": jax.random.normal(ks[1], (1, nh), jnp.float32) * std,
        "wk": jax.random.normal(ks[2], (hidden_size, nh), jnp.float32) * std,
        "bk": jax.random.normal(ks[3], (1, nh), jnp.float32) * std,
        "wv": jax.random.normal(ks[4], (hidden_size, nh), jnp.float32) * std,
        "bv": jax.random.normal(ks[5], (1, nh), jnp.float32) * std,
        "wo": jax.random.normal(ks[6], (nh, hidden_size), jnp.float32) * std,
        "bo": jax.random.normal(ks[7], (1, hidden_size), jnp.float32) * std,
        "ln1_g": jnp.ones((1, hidden_size), jnp.float32),
        "ln1_b": jnp.zeros((1, hidden_size), jnp.float32),
        "w1": jax.random.normal(ks[8], (hidden_size, 4 * hidden_size), jnp.float32) * std,
        "b1": jax.random.normal(ks[9], (1, 4 * hidden_size), jnp.float32) * std,
        "w2": jax.random.normal(ks[10], (4 * hidden_size, hidden_size), jnp.float32) * std,
        "b2": jax.random.normal(ks[11], (1, hidden_size), jnp.float32) * std,
        "ln2_g": jnp.ones((1, hidden_size), jnp.float32),
        "ln2_b": jnp.zeros((1, hidden_size), jnp.float32),
    }


def reference_block(x, params, *, num_heads, head_size):
    """Pure-JAX f32 reference mirroring the PyTorch module."""
    B, S, H = x.shape
    q = x @ params["wq"] + params["bq"]
    k = x @ params["wk"] + params["bk"]
    v = x @ params["wv"] + params["bv"]

    def split(t):
        return t.reshape(B, S, num_heads, head_size).transpose(0, 2, 1, 3)

    q, k, v = split(q), split(k), split(v)
    s = (q @ k.transpose(0, 1, 3, 2)) / (head_size ** 0.5)
    p = jax.nn.softmax(s, axis=-1)
    ctx = (p @ v).transpose(0, 2, 1, 3).reshape(B, S, -1)
    attn = ctx @ params["wo"] + params["bo"]

    def ln(h, g, b):
        mu = h.mean(-1, keepdims=True)
        var = ((h - mu) ** 2).mean(-1, keepdims=True)
        return (h - mu) * jax.lax.rsqrt(var + LN_EPS) * g + b

    y = ln(x + attn, params["ln1_g"], params["ln1_b"])
    h1 = jnp.maximum(y @ params["w1"] + params["b1"], 0.0)
    h2 = h1 @ params["w2"] + params["b2"]
    return ln(y + h2, params["ln2_g"], params["ln2_b"])


if __name__ == "__main__":
    # Small shapes consistent with the module: batch=2, seq=8, hidden=32, 4 heads of size 8.
    batch, seq_len, hidden_size = 2, 8, 32
    num_heads, head_size = 4, 8

    key = jax.random.PRNGKey(0)
    kx, kp = jax.random.split(key)
    x = jax.random.normal(kx, (batch, seq_len, hidden_size), jnp.float32)
    params = init_params(kp, hidden_size, head_size, num_heads)

    out = transformer_block(x, params, num_heads=num_heads, head_size=head_size)
    out = jax.block_until_ready(out)
    assert out.shape == (batch, seq_len, hidden_size)
    assert bool(jnp.all(jnp.isfinite(out)))

    ref = reference_block(x, params, num_heads=num_heads, head_size=head_size)
    err = float(jnp.max(jnp.abs(out - ref)))
    assert err < 0.05, f"max abs error vs f32 reference too large: {err}"
    print("KERNEL_OK")
</pallas_src>

<mosaic_0001>
module attributes {stable_mosaic.version = 11 : i64} {
  func.func @_transformer_block_kernel(%arg0: i32, %arg1: i32, %arg2: memref<1x8x32xf32, #tpu.memory_space<vmem>>, %arg3: memref<1x8x32xf32, #tpu.memory_space<vmem>>, %arg4: memref<32x32xbf16, #tpu.memory_space<vmem>>, %arg5: memref<1x32xf32, #tpu.memory_space<vmem>>, %arg6: memref<32x64xbf16, #tpu.memory_space<vmem>>, %arg7: memref<1x64xf32, #tpu.memory_space<vmem>>, %arg8: memref<32x32xbf16, #tpu.memory_space<vmem>>, %arg9: memref<1x32xf32, #tpu.memory_space<vmem>>, %arg10: memref<1x32xf32, #tpu.memory_space<vmem>>, %arg11: memref<1x32xf32, #tpu.memory_space<vmem>>, %arg12: memref<32x128xbf16, #tpu.memory_space<vmem>>, %arg13: memref<1x128xf32, #tpu.memory_space<vmem>>, %arg14: memref<128x32xbf16, #tpu.memory_space<vmem>>, %arg15: memref<1x32xf32, #tpu.memory_space<vmem>>, %arg16: memref<1x32xf32, #tpu.memory_space<vmem>>, %arg17: memref<1x32xf32, #tpu.memory_space<vmem>>, %arg18: memref<1x8x32xf32, #tpu.memory_space<vmem>>) attributes {dimension_semantics = [#tpu.dimension_semantics<parallel>, #tpu.dimension_semantics<parallel>], iteration_bounds = array<i64: 2, 1>, scalar_prefetch = 0 : i64, scratch_operands = 0 : i64, tpu.core_type = #tpu.core_type<tc>, window_params = [{transform_indices = @transform_0, window_bounds = array<i64: 1, 8, 32>}, {transform_indices = @transform_1, window_bounds = array<i64: 1, 8, 32>}, {pipeline_mode = #tpu.pipeline_mode<synchronous>, transform_indices = @transform_2, window_bounds = array<i64: 32, 32>}, {pipeline_mode = #tpu.pipeline_mode<synchronous>, transform_indices = @transform_3, window_bounds = array<i64: 1, 32>}, {pipeline_mode = #tpu.pipeline_mode<synchronous>, transform_indices = @transform_4, window_bounds = array<i64: 32, 64>}, {pipeline_mode = #tpu.pipeline_mode<synchronous>, transform_indices = @transform_5, window_bounds = array<i64: 1, 64>}, {pipeline_mode = #tpu.pipeline_mode<synchronous>, transform_indices = @transform_6, window_bounds = array<i64: 32, 32>}, {pipeline_mode = #tpu.pipeline_mode<synchronous>, transform_indices = @transform_7, window_bounds = array<i64: 1, 32>}, {pipeline_mode = #tpu.pipeline_mode<synchronous>, transform_indices = @transform_8, window_bounds = array<i64: 1, 32>}, {pipeline_mode = #tpu.pipeline_mode<synchronous>, transform_indices = @transform_9, window_bounds = array<i64: 1, 32>}, {pipeline_mode = #tpu.pipeline_mode<synchronous>, transform_indices = @transform_10, window_bounds = array<i64: 32, 128>}, {pipeline_mode = #tpu.pipeline_mode<synchronous>, transform_indices = @transform_11, window_bounds = array<i64: 1, 128>}, {pipeline_mode = #tpu.pipeline_mode<synchronous>, transform_indices = @transform_12, window_bounds = array<i64: 128, 32>}, {pipeline_mode = #tpu.pipeline_mode<synchronous>, transform_indices = @transform_13, window_bounds = array<i64: 1, 32>}, {pipeline_mode = #tpu.pipeline_mode<synchronous>, transform_indices = @transform_14, window_bounds = array<i64: 1, 32>}, {pipeline_mode = #tpu.pipeline_mode<synchronous>, transform_indices = @transform_15, window_bounds = array<i64: 1, 32>}, {transform_indices = @transform_16, window_bounds = array<i64: 1, 8, 32>}]} {
    %c0 = arith.constant 0 : index
    %c0_0 = arith.constant 0 : index
    %c0_1 = arith.constant 0 : index
    %0 = vector.load %arg2[%c0, %c0_0, %c0_1] : memref<1x8x32xf32, #tpu.memory_space<vmem>>, vector<1x8x32xf32>
    %1 = vector.shape_cast %0 : vector<1x8x32xf32> to vector<8x32xf32>
    %c0_2 = arith.constant 0 : index
    %c0_3 = arith.constant 0 : index
    %c0_4 = arith.constant 0 : index
    %2 = vector.load %arg3[%c0_2, %c0_3, %c0_4] : memref<1x8x32xf32, #tpu.memory_space<vmem>>, vector<1x8x32xf32>
    %3 = vector.shape_cast %2 : vector<1x8x32xf32> to vector<8x32xf32>
    %4 = arith.truncf %1 : vector<8x32xf32> to vector<8x32xbf16>
    %c0_5 = arith.constant 0 : index
    %c0_6 = arith.constant 0 : index
    %5 = vector.load %arg4[%c0_5, %c0_6] : memref<32x32xbf16, #tpu.memory_space<vmem>>, vector<32x32xbf16>
    %cst = arith.constant dense<0.000000e+00> : vector<8x32xf32>
    %6 = tpu.matmul %4, %5, %cst {dimension_numbers = #tpu.dot_dimension_numbers<[1], [0], [0], [1], [0, 0, 1, 1], [], []>} : vector<8x32xbf16>, vector<32x32xbf16>, vector<8x32xf32> -> vector<8x32xf32>
    %c0_7 = arith.constant 0 : index
    %c0_8 = arith.constant 0 : index
    %7 = vector.load %arg5[%c0_7, %c0_8] : memref<1x32xf32, #tpu.memory_space<vmem>>, vector<1x32xf32>
    %8 = vector.broadcast %7 : vector<1x32xf32> to vector<8x32xf32>
    %9 = arith.addf %6, %8 : vector<8x32xf32>
    %10 = arith.truncf %9 : vector<8x32xf32> to vector<8x32xbf16>
    %11 = arith.truncf %3 : vector<8x32xf32> to vector<8x32xbf16>
    %c0_9 = arith.constant 0 : index
    %c0_10 = arith.constant 0 : index
    %12 = vector.load %arg6[%c0_9, %c0_10] : memref<32x64xbf16, #tpu.memory_space<vmem>>, vector<32x64xbf16>
    %cst_11 = arith.constant dense<0.000000e+00> : vector<8x64xf32>
    %13 = tpu.matmul %11, %12, %cst_11 {dimension_numbers = #tpu.dot_dimension_numbers<[1], [0], [0], [1], [0, 0, 1, 1], [], []>} : vector<8x32xbf16>, vector<32x64xbf16>, vector<8x64xf32> -> vector<8x64xf32>
    %c0_12 = arith.constant 0 : index
    %c0_13 = arith.constant 0 : index
    %14 = vector.load %arg7[%c0_12, %c0_13] : memref<1x64xf32, #tpu.memory_space<vmem>>, vector<1x64xf32>
    %15 = vector.broadcast %14 : vector<1x64xf32> to vector<8x64xf32>
    %16 = arith.addf %13, %15 : vector<8x64xf32>
    %17 = arith.truncf %16 : vector<8x64xf32> to vector<8x64xbf16>
    %18 = vector.extract_strided_slice %10 {offsets = [0, 0], sizes = [8, 8], strides = [1, 1]} : vector<8x32xbf16> to vector<8x8xbf16>
    %19 = vector.extract_strided_slice %17 {offsets = [0, 0], sizes = [8, 8], strides = [1, 1]} : vector<8x64xbf16> to vector<8x8xbf16>
    %20 = vector.extract_strided_slice %17 {offsets = [0, 32], sizes = [8, 8], strides = [1, 1]} : vector<8x64xbf16> to vector<8x8xbf16>
    %21 = tpu.transpose %19, [1, 0] : vector<8x8xbf16> -> vector<8x8xbf16>
    %cst_14 = arith.constant dense<0.000000e+00> : vector<8x8xf32>
    %22 = tpu.matmul %18, %21, %cst_14 {dimension_numbers = #tpu.dot_dimension_numbers<[1], [0], [0], [1], [0, 0, 1, 1], [], []>} : vector<8x8xbf16>, vector<8x8xbf16>, vector<8x8xf32> -> vector<8x8xf32>
    %cst_15 = arith.constant dense<0xFF800000> : vector<8xf32>
    %23 = vector.multi_reduction <maximumf>, %22, %cst_15 [1] : vector<8x8xf32> to vector<8xf32>
    %24 = vector.shape_cast %23 : vector<8xf32> to vector<8x1xf32>
    %25 = vector.broadcast %24 : vector<8x1xf32> to vector<8x8xf32>
    %26 = arith.subf %22, %25 : vector<8x8xf32>
    %27 = math.exp %26 : vector<8x8xf32>
    %cst_16 = arith.constant dense<0.000000e+00> : vector<8xf32>
    %28 = vector.multi_reduction <add>, %27, %cst_16 [1] : vector<8x8xf32> to vector<8xf32>
    %29 = vector.shape_cast %28 : vector<8xf32> to vector<8x1xf32>
    %30 = tpu.reciprocal %29 {approx = true} : vector<8x1xf32> -> vector<8x1xf32>
    %31 = vector.broadcast %30 : vector<8x1xf32> to vector<8x8xf32>
    %32 = arith.mulf %27, %31 : vector<8x8xf32>
    %33 = arith.truncf %32 : vector<8x8xf32> to vector<8x8xbf16>
    %cst_17 = arith.constant dense<0.000000e+00> : vector<8x8xf32>
    %34 = tpu.matmul %33, %20, %cst_17 {dimension_numbers = #tpu.dot_dimension_numbers<[1], [0], [0], [1], [0, 0, 1, 1], [], []>} : vector<8x8xbf16>, vector<8x8xbf16>, vector<8x8xf32> -> vector<8x8xf32>
    %35 = vector.extract_strided_slice %10 {offsets = [0, 8], sizes = [8, 8], strides = [1, 1]} : vector<8x32xbf16> to vector<8x8xbf16>
    %36 = vector.extract_strided_slice %17 {offsets = [0, 8], sizes = [8, 8], strides = [1, 1]} : vector<8x64xbf16> to vector<8x8xbf16>
    %37 = vector.extract_strided_slice %17 {offsets = [0, 40], sizes = [8, 8], strides = [1, 1]} : vector<8x64xbf16> to vector<8x8xbf16>
    %38 = tpu.transpose %36, [1, 0] : vector<8x8xbf16> -> vector<8x8xbf16>
    %cst_18 = arith.constant dense<0.000000e+00> : vector<8x8xf32>
    %39 = tpu.matmul %35, %38, %cst_18 {dimension_numbers = #tpu.dot_dimension_numbers<[1], [0], [0], [1], [0, 0, 1, 1], [], []>} : vector<8x8xbf16>, vector<8x8xbf16>, vector<8x8xf32> -> vector<8x8xf32>
    %cst_19 = arith.constant dense<0xFF800000> : vector<8xf32>
    %40 = vector.multi_reduction <maximumf>, %39, %cst_19 [1] : vector<8x8xf32> to vector<8xf32>
    %41 = vector.shape_cast %40 : vector<8xf32> to vector<8x1xf32>
    %42 = vector.broadcast %41 : vector<8x1xf32> to vector<8x8xf32>
    %43 = arith.subf %39, %42 : vector<8x8xf32>
    %44 = math.exp %43 : vector<8x8xf32>
    %cst_20 = arith.constant dense<0.000000e+00> : vector<8xf32>
    %45 = vector.multi_reduction <add>, %44, %cst_20 [1] : vector<8x8xf32> to vector<8xf32>
    %46 = vector.shape_cast %45 : vector<8xf32> to vector<8x1xf32>
    %47 = tpu.reciprocal %46 {approx = true} : vector<8x1xf32> -> vector<8x1xf32>
    %48 = vector.broadcast %47 : vector<8x1xf32> to vector<8x8xf32>
    %49 = arith.mulf %44, %48 : vector<8x8xf32>
    %50 = arith.truncf %49 : vector<8x8xf32> to vector<8x8xbf16>
    %cst_21 = arith.constant dense<0.000000e+00> : vector<8x8xf32>
    %51 = tpu.matmul %50, %37, %cst_21 {dimension_numbers = #tpu.dot_dimension_numbers<[1], [0], [0], [1], [0, 0, 1, 1], [], []>} : vector<8x8xbf16>, vector<8x8xbf16>, vector<8x8xf32> -> vector<8x8xf32>
    %52 = vector.extract_strided_slice %10 {offsets = [0, 16], sizes = [8, 8], strides = [1, 1]} : vector<8x32xbf16> to vector<8x8xbf16>
    %53 = vector.extract_strided_slice %17 {offsets = [0, 16], sizes = [8, 8], strides = [1, 1]} : vector<8x64xbf16> to vector<8x8xbf16>
    %54 = vector.extract_strided_slice %17 {offsets = [0, 48], sizes = [8, 8], strides = [1, 1]} : vector<8x64xbf16> to vector<8x8xbf16>
    %55 = tpu.transpose %53, [1, 0] : vector<8x8xbf16> -> vector<8x8xbf16>
    %cst_22 = arith.constant dense<0.000000e+00> : vector<8x8xf32>
    %56 = tpu.matmul %52, %55, %cst_22 {dimension_numbers = #tpu.dot_dimension_numbers<[1], [0], [0], [1], [0, 0, 1, 1], [], []>} : vector<8x8xbf16>, vector<8x8xbf16>, vector<8x8xf32> -> vector<8x8xf32>
    %cst_23 = arith.constant dense<0xFF800000> : vector<8xf32>
    %57 = vector.multi_reduction <maximumf>, %56, %cst_23 [1] : vector<8x8xf32> to vector<8xf32>
    %58 = vector.shape_cast %57 : vector<8xf32> to vector<8x1xf32>
    %59 = vector.broadcast %58 : vector<8x1xf32> to vector<8x8xf32>
    %60 = arith.subf %56, %59 : vector<8x8xf32>
    %61 = math.exp %60 : vector<8x8xf32>
    %cst_24 = arith.constant dense<0.000000e+00> : vector<8xf32>
    %62 = vector.multi_reduction <add>, %61, %cst_24 [1] : vector<8x8xf32> to vector<8xf32>
    %63 = vector.shape_cast %62 : vector<8xf32> to vector<8x1xf32>
    %64 = tpu.reciprocal %63 {approx = true} : vector<8x1xf32> -> vector<8x1xf32>
    %65 = vector.broadcast %64 : vector<8x1xf32> to vector<8x8xf32>
    %66 = arith.mulf %61, %65 : vector<8x8xf32>
    %67 = arith.truncf %66 : vector<8x8xf32> to vector<8x8xbf16>
    %cst_25 = arith.constant dense<0.000000e+00> : vector<8x8xf32>
    %68 = tpu.matmul %67, %54, %cst_25 {dimension_numbers = #tpu.dot_dimension_numbers<[1], [0], [0], [1], [0, 0, 1, 1], [], []>} : vector<8x8xbf16>, vector<8x8xbf16>, vector<8x8xf32> -> vector<8x8xf32>
    %69 = vector.extract_strided_slice %10 {offsets = [0, 24], sizes = [8, 8], strides = [1, 1]} : vector<8x32xbf16> to vector<8x8xbf16>
    %70 = vector.extract_strided_slice %17 {offsets = [0, 24], sizes = [8, 8], strides = [1, 1]} : vector<8x64xbf16> to vector<8x8xbf16>
    %71 = vector.extract_strided_slice %17 {offsets = [0, 56], sizes = [8, 8], strides = [1, 1]} : vector<8x64xbf16> to vector<8x8xbf16>
    %72 = tpu.transpose %70, [1, 0] : vector<8x8xbf16> -> vector<8x8xbf16>
    %cst_26 = arith.constant dense<0.000000e+00> : vector<8x8xf32>
    %73 = tpu.matmul %69, %72, %cst_26 {dimension_numbers = #tpu.dot_dimension_numbers<[1], [0], [0], [1], [0, 0, 1, 1], [], []>} : vector<8x8xbf16>, vector<8x8xbf16>, vector<8x8xf32> -> vector<8x8xf32>
    %cst_27 = arith.constant dense<0xFF800000> : vector<8xf32>
    %74 = vector.multi_reduction <maximumf>, %73, %cst_27 [1] : vector<8x8xf32> to vector<8xf32>
    %75 = vector.shape_cast %74 : vector<8xf32> to vector<8x1xf32>
    %76 = vector.broadcast %75 : vector<8x1xf32> to vector<8x8xf32>
    %77 = arith.subf %73, %76 : vector<8x8xf32>
    %78 = math.exp %77 : vector<8x8xf32>
    %cst_28 = arith.constant dense<0.000000e+00> : vector<8xf32>
    %79 = vector.multi_reduction <add>, %78, %cst_28 [1] : vector<8x8xf32> to vector<8xf32>
    %80 = vector.shape_cast %79 : vector<8xf32> to vector<8x1xf32>
    %81 = tpu.reciprocal %80 {approx = true} : vector<8x1xf32> -> vector<8x1xf32>
    %82 = vector.broadcast %81 : vector<8x1xf32> to vector<8x8xf32>
    %83 = arith.mulf %78, %82 : vector<8x8xf32>
    %84 = arith.truncf %83 : vector<8x8xf32> to vector<8x8xbf16>
    %cst_29 = arith.constant dense<0.000000e+00> : vector<8x8xf32>
    %85 = tpu.matmul %84, %71, %cst_29 {dimension_numbers = #tpu.dot_dimension_numbers<[1], [0], [0], [1], [0, 0, 1, 1], [], []>} : vector<8x8xbf16>, vector<8x8xbf16>, vector<8x8xf32> -> vector<8x8xf32>
    %86 = tpu.concatenate %34, %51, %68, %85 in 1 : vector<8x8xf32>, vector<8x8xf32>, vector<8x8xf32>, vector<8x8xf32> -> vector<8x32xf32>
    %87 = arith.truncf %86 : vector<8x32xf32> to vector<8x32xbf16>
    %c0_30 = arith.constant 0 : index
    %c0_31 = arith.constant 0 : index
    %88 = vector.load %arg8[%c0_30, %c0_31] : memref<32x32xbf16, #tpu.memory_space<vmem>>, vector<32x32xbf16>
    %cst_32 = arith.constant dense<0.000000e+00> : vector<8x32xf32>
    %89 = tpu.matmul %87, %88, %cst_32 {dimension_numbers = #tpu.dot_dimension_numbers<[1], [0], [0], [1], [0, 0, 1, 1], [], []>} : vector<8x32xbf16>, vector<32x32xbf16>, vector<8x32xf32> -> vector<8x32xf32>
    %c0_33 = arith.constant 0 : index
    %c0_34 = arith.constant 0 : index
    %90 = vector.load %arg9[%c0_33, %c0_34] : memref<1x32xf32, #tpu.memory_space<vmem>>, vector<1x32xf32>
    %91 = vector.broadcast %90 : vector<1x32xf32> to vector<8x32xf32>
    %92 = arith.addf %89, %91 : vector<8x32xf32>
    %93 = arith.addf %1, %92 : vector<8x32xf32>
    %c0_35 = arith.constant 0 : index
    %c0_36 = arith.constant 0 : index
    %94 = vector.load %arg10[%c0_35, %c0_36] : memref<1x32xf32, #tpu.memory_space<vmem>>, vector<1x32xf32>
    %c0_37 = arith.constant 0 : index
    %c0_38 = arith.constant 0 : index
    %95 = vector.load %arg11[%c0_37, %c0_38] : memref<1x32xf32, #tpu.memory_space<vmem>>, vector<1x32xf32>
    %cst_39 = arith.constant dense<0.000000e+00> : vector<8xf32>
    %96 = vector.multi_reduction <add>, %93, %cst_39 [1] : vector<8x32xf32> to vector<8xf32>
    %97 = vector.shape_cast %96 : vector<8xf32> to vector<8x1xf32>
    %cst_40 = arith.constant 3.200000e+01 : f32
    %98 = vector.broadcast %cst_40 : f32 to vector<8x1xf32>
    %99 = arith.divf %97, %98 : vector<8x1xf32>
    %100 = vector.broadcast %99 : vector<8x1xf32> to vector<8x32xf32>
    %101 = arith.subf %93, %100 : vector<8x32xf32>
    %102 = arith.mulf %101, %101 : vector<8x32xf32>
    %cst_41 = arith.constant dense<0.000000e+00> : vector<8xf32>
    %103 = vector.multi_reduction <add>, %102, %cst_41 [1] : vector<8x32xf32> to vector<8xf32>
    %104 = vector.shape_cast %103 : vector<8xf32> to vector<8x1xf32>
    %cst_42 = arith.constant 3.200000e+01 : f32
    %105 = vector.broadcast %cst_42 : f32 to vector<8x1xf32>
    %106 = arith.divf %104, %105 : vector<8x1xf32>
    %107 = vector.broadcast %99 : vector<8x1xf32> to vector<8x32xf32>
    %108 = arith.subf %93, %107 : vector<8x32xf32>
    %cst_43 = arith.constant 9.99999974E-6 : f32
    %109 = vector.broadcast %cst_43 : f32 to vector<8x1xf32>
    %110 = arith.addf %106, %109 : vector<8x1xf32>
    %111 = math.rsqrt %110 : vector<8x1xf32>
    %112 = vector.broadcast %111 : vector<8x1xf32> to vector<8x32xf32>
    %113 = arith.mulf %108, %112 : vector<8x32xf32>
    %114 = vector.broadcast %94 : vector<1x32xf32> to vector<8x32xf32>
    %115 = arith.mulf %113, %114 : vector<8x32xf32>
    %116 = vector.broadcast %95 : vector<1x32xf32> to vector<8x32xf32>
    %117 = arith.addf %115, %116 : vector<8x32xf32>
    %118 = arith.truncf %117 : vector<8x32xf32> to vector<8x32xbf16>
    %c0_44 = arith.constant 0 : index
    %c0_45 = arith.constant 0 : index
    %119 = vector.load %arg12[%c0_44, %c0_45] : memref<32x128xbf16, #tpu.memory_space<vmem>>, vector<32x128xbf16>
    %cst_46 = arith.constant dense<0.000000e+00> : vector<8x128xf32>
    %120 = tpu.matmul %118, %119, %cst_46 {dimension_numbers = #tpu.dot_dimension_numbers<[1], [0], [0], [1], [0, 0, 1, 1], [], []>} : vector<8x32xbf16>, vector<32x128xbf16>, vector<8x128xf32> -> vector<8x128xf32>
    %c0_47 = arith.constant 0 : index
    %c0_48 = arith.constant 0 : index
    %121 = vector.load %arg13[%c0_47, %c0_48] : memref<1x128xf32, #tpu.memory_space<vmem>>, vector<1x128xf32>
    %122 = vector.broadcast %121 : vector<1x128xf32> to vector<8x128xf32>
    %123 = arith.addf %120, %122 : vector<8x128xf32>
    %cst_49 = arith.constant 0.000000e+00 : f32
    %124 = vector.broadcast %cst_49 : f32 to vector<8x128xf32>
    %125 = arith.maximumf %123, %124 : vector<8x128xf32>
    %126 = arith.truncf %125 : vector<8x128xf32> to vector<8x128xbf16>
    %c0_50 = arith.constant 0 : index
    %c0_51 = arith.constant 0 : index
    %127 = vector.load %arg14[%c0_50, %c0_51] : memref<128x32xbf16, #tpu.memory_space<vmem>>, vector<128x32xbf16>
    %cst_52 = arith.constant dense<0.000000e+00> : vector<8x32xf32>
    %128 = tpu.matmul %126, %127, %cst_52 {dimension_numbers = #tpu.dot_dimension_numbers<[1], [0], [0], [1], [0, 0, 1, 1], [], []>} : vector<8x128xbf16>, vector<128x32xbf16>, vector<8x32xf32> -> vector<8x32xf32>
    %c0_53 = arith.constant 0 : index
    %c0_54 = arith.constant 0 : index
    %129 = vector.load %arg15[%c0_53, %c0_54] : memref<1x32xf32, #tpu.memory_space<vmem>>, vector<1x32xf32>
    %130 = vector.broadcast %129 : vector<1x32xf32> to vector<8x32xf32>
    %131 = arith.addf %128, %130 : vector<8x32xf32>
    %132 = arith.addf %117, %131 : vector<8x32xf32>
    %c0_55 = arith.constant 0 : index
    %c0_56 = arith.constant 0 : index
    %133 = vector.load %arg16[%c0_55, %c0_56] : memref<1x32xf32, #tpu.memory_space<vmem>>, vector<1x32xf32>
    %c0_57 = arith.constant 0 : index
    %c0_58 = arith.constant 0 : index
    %134 = vector.load %arg17[%c0_57, %c0_58] : memref<1x32xf32, #tpu.memory_space<vmem>>, vector<1x32xf32>
    %cst_59 = arith.constant dense<0.000000e+00> : vector<8xf32>
    %135 = vector.multi_reduction <add>, %132, %cst_59 [1] : vector<8x32xf32> to vector<8xf32>
    %136 = vector.shape_cast %135 : vector<8xf32> to vector<8x1xf32>
    %cst_60 = arith.constant 3.200000e+01 : f32
    %137 = vector.broadcast %cst_60 : f32 to vector<8x1xf32>
    %138 = arith.divf %136, %137 : vector<8x1xf32>
    %139 = vector.broadcast %138 : vector<8x1xf32> to vector<8x32xf32>
    %140 = arith.subf %132, %139 : vector<8x32xf32>
    %141 = arith.mulf %140, %140 : vector<8x32xf32>
    %cst_61 = arith.constant dense<0.000000e+00> : vector<8xf32>
    %142 = vector.multi_reduction <add>, %141, %cst_61 [1] : vector<8x32xf32> to vector<8xf32>
    %143 = vector.shape_cast %142 : vector<8xf32> to vector<8x1xf32>
    %cst_62 = arith.constant 3.200000e+01 : f32
    %144 = vector.broadcast %cst_62 : f32 to vector<8x1xf32>
    %145 = arith.divf %143, %144 : vector<8x1xf32>
    %146 = vector.broadcast %138 : vector<8x1xf32> to vector<8x32xf32>
    %147 = arith.subf %132, %146 : vector<8x32xf32>
    %cst_63 = arith.constant 9.99999974E-6 : f32
    %148 = vector.broadcast %cst_63 : f32 to vector<8x1xf32>
    %149 = arith.addf %145, %148 : vector<8x1xf32>
    %150 = math.rsqrt %149 : vector<8x1xf32>
    %151 = vector.broadcast %150 : vector<8x1xf32> to vector<8x32xf32>
    %152 = arith.mulf %147, %151 : vector<8x32xf32>
    %153 = vector.broadcast %133 : vector<1x32xf32> to vector<8x32xf32>
    %154 = arith.mulf %152, %153 : vector<8x32xf32>
    %155 = vector.broadcast %134 : vector<1x32xf32> to vector<8x32xf32>
    %156 = arith.addf %154, %155 : vector<8x32xf32>
    %c0_64 = arith.constant 0 : index
    %c0_65 = arith.constant 0 : index
    %c0_66 = arith.constant 0 : index
    %157 = vector.load %arg18[%c0_64, %c0_65, %c0_66] : memref<1x8x32xf32, #tpu.memory_space<vmem>>, vector<1x8x32xf32>
    %158 = vector.shape_cast %157 : vector<1x8x32xf32> to vector<8x32xf32>
    %159 = vector.shape_cast %156 : vector<8x32xf32> to vector<1x8x32xf32>
    tpu.vector_store %arg18[%c0_64, %c0_65, %c0_66], %159 {strides = array<i32>} : memref<1x8x32xf32, #tpu.memory_space<vmem>>, vector<1x8x32xf32>,
    return
  }
  func.func @transform_0(%arg0: i32, %arg1: i32) -> (i32, i32, i32) {
    %c0_i32 = arith.constant 0 : i32
    %c0_i32_0 = arith.constant 0 : i32
    return %arg0, %arg1, %c0_i32 : i32, i32, i32
  }
  func.func @transform_1(%arg0: i32, %arg1: i32) -> (i32, i32, i32) {
    %c0_i32 = arith.constant 0 : i32
    %c0_i32_0 = arith.constant 0 : i32
    %c0_i32_1 = arith.constant 0 : i32
    return %arg0, %c0_i32, %c0_i32_0 : i32, i32, i32
  }
  func.func @transform_2(%arg0: i32, %arg1: i32) -> (i32, i32) {
    %c0_i32 = arith.constant 0 : i32
    %c0_i32_0 = arith.constant 0 : i32
    %c0_i32_1 = arith.constant 0 : i32
    return %c0_i32, %c0_i32_0 : i32, i32
  }
  func.func @transform_3(%arg0: i32, %arg1: i32) -> (i32, i32) {
    %c0_i32 = arith.constant 0 : i32
    %c0_i32_0 = arith.constant 0 : i32
    %c0_i32_1 = arith.constant 0 : i32
    return %c0_i32, %c0_i32_0 : i32, i32
  }
  func.func @transform_4(%arg0: i32, %arg1: i32) -> (i32, i32) {
    %c0_i32 = arith.constant 0 : i32
    %c0_i32_0 = arith.constant 0 : i32
    %c0_i32_1 = arith.constant 0 : i32
    return %c0_i32, %c0_i32_0 : i32, i32
  }
  func.func @transform_5(%arg0: i32, %arg1: i32) -> (i32, i32) {
    %c0_i32 = arith.constant 0 : i32
    %c0_i32_0 = arith.constant 0 : i32
    %c0_i32_1 = arith.constant 0 : i32
    return %c0_i32, %c0_i32_0 : i32, i32
  }
  func.func @transform_6(%arg0: i32, %arg1: i32) -> (i32, i32) {
    %c0_i32 = arith.constant 0 : i32
    %c0_i32_0 = arith.constant 0 : i32
    %c0_i32_1 = arith.constant 0 : i32
    return %c0_i32, %c0_i32_0 : i32, i32
  }
  func.func @transform_7(%arg0: i32, %arg1: i32) -> (i32, i32) {
    %c0_i32 = arith.constant 0 : i32
    %c0_i32_0 = arith.constant 0 : i32
    %c0_i32_1 = arith.constant 0 : i32
    return %c0_i32, %c0_i32_0 : i32, i32
  }
  func.func @transform_8(%arg0: i32, %arg1: i32) -> (i32, i32) {
    %c0_i32 = arith.constant 0 : i32
    %c0_i32_0 = arith.constant 0 : i32
    %c0_i32_1 = arith.constant 0 : i32
    return %c0_i32, %c0_i32_0 : i32, i32
  }
  func.func @transform_9(%arg0: i32, %arg1: i32) -> (i32, i32) {
    %c0_i32 = arith.constant 0 : i32
    %c0_i32_0 = arith.constant 0 : i32
    %c0_i32_1 = arith.constant 0 : i32
    return %c0_i32, %c0_i32_0 : i32, i32
  }
  func.func @transform_10(%arg0: i32, %arg1: i32) -> (i32, i32) {
    %c0_i32 = arith.constant 0 : i32
    %c0_i32_0 = arith.constant 0 : i32
    %c0_i32_1 = arith.constant 0 : i32
    return %c0_i32, %c0_i32_0 : i32, i32
  }
  func.func @transform_11(%arg0: i32, %arg1: i32) -> (i32, i32) {
    %c0_i32 = arith.constant 0 : i32
    %c0_i32_0 = arith.constant 0 : i32
    %c0_i32_1 = arith.constant 0 : i32
    return %c0_i32, %c0_i32_0 : i32, i32
  }
  func.func @transform_12(%arg0: i32, %arg1: i32) -> (i32, i32) {
    %c0_i32 = arith.constant 0 : i32
    %c0_i32_0 = arith.constant 0 : i32
    %c0_i32_1 = arith.constant 0 : i32
    return %c0_i32, %c0_i32_0 : i32, i32
  }
  func.func @transform_13(%arg0: i32, %arg1: i32) -> (i32, i32) {
    %c0_i32 = arith.constant 0 : i32
    %c0_i32_0 = arith.constant 0 : i32
    %c0_i32_1 = arith.constant 0 : i32
    return %c0_i32, %c0_i32_0 : i32, i32
  }
  func.func @transform_14(%arg0: i32, %arg1: i32) -> (i32, i32) {
    %c0_i32 = arith.constant 0 : i32
    %c0_i32_0 = arith.constant 0 : i32
    %c0_i32_1 = arith.constant 0 : i32
    return %c0_i32, %c0_i32_0 : i32, i32
  }
  func.func @transform_15(%arg0: i32, %arg1: i32) -> (i32, i32) {
    %c0_i32 = arith.constant 0 : i32
    %c0_i32_0 = arith.constant 0 : i32
    %c0_i32_1 = arith.constant 0 : i32
    return %c0_i32, %c0_i32_0 : i32, i32
  }
  func.func @transform_16(%arg0: i32, %arg1: i32) -> (i32, i32, i32) {
    %c0_i32 = arith.constant 0 : i32
    %c0_i32_0 = arith.constant 0 : i32
    return %arg0, %arg1, %c0_i32 : i32, i32, i32
  }
}

</mosaic_0001>

<bundles_post_ra>
// kernel: tpu_custom_call.1
= control target key start
LH: loop header
LB: loop body
LE: loop exit
PB: predicated region body
PF: predicated region fallthrough
CT: control target
= control target key end

     0   :  { %s1890_s0 = inlined_call_operand.vmem [shape: f32[2,8,32], index: 0, kind: input, shape index: {}]   ;;  %s1891_s1 = inlined_call_operand.vmem [shape: f32[2,8,32], index: 1, kind: input, shape index: {}]   ;;  %s1892_s2 = inlined_call_operand.vmem [shape: bf16[32,32], index: 2, kind: input, shape index: {}]   ;;  %s1893_s3 = inlined_call_operand.vmem [shape: f32[1,32], index: 3, kind: input, shape index: {}]   ;;  %s1894_s4 = inlined_call_operand.vmem [shape: bf16[32,64], index: 4, kind: input, shape index: {}]   ;;  %s1895_s5 = inlined_call_operand.vmem [shape: f32[1,64], index: 5, kind: input, shape index: {}]   ;;  %s1896_s6 = inlined_call_operand.vmem [shape: bf16[32,32], index: 6, kind: input, shape index: {}]   ;;  %s1897_s7 = inlined_call_operand.vmem [shape: f32[1,32], index: 7, kind: input, shape index: {}]   ;;  %s1898_s8 = inlined_call_operand.vmem [shape: f32[1,32], index: 8, kind: input, shape index: {}]   ;;  %s1899_s9 = inlined_call_operand.vmem [shape: f32[1,32], index: 9, kind: input, shape index: {}]   ;;  %s1900_s10 = inlined_call_operand.hbm [shape: bf16[32,128], index: 10, kind: input, shape index: {}]   ;;  %s1901_s11 = inlined_call_operand.vmem [shape: f32[1,128], index: 11, kind: input, shape index: {}]   ;;  %s1902_s12 = inlined_call_operand.vmem [shape: bf16[128,32], index: 12, kind: input, shape index: {}]   ;;  %s1903_s13 = inlined_call_operand.vmem [shape: f32[1,32], index: 13, kind: input, shape index: {}]   ;;  %s1904_s14 = inlined_call_operand.vmem [shape: f32[1,32], index: 14, kind: input, shape index: {}]   ;;  %s1905_s15 = inlined_call_operand.vmem [shape: f32[1,32], index: 15, kind: input, shape index: {}]   ;;  %s1906_s16 = inlined_call_operand.hbm [shape: f32[2,8,32], index: 16, kind: output, shape index: {}]  }
   0x1   :  { %1917 = sst [smem:[#allocation16_spill]] %s1890_s0 }
   0x2   :  { %1918 = sst [smem:[#allocation17_spill]] %s1900_s10 }
   0x3   :  { %1919 = sst [smem:[#allocation18_spill]] %s1905_s15 }
   0x4   :  { %1920 = sst [smem:[#allocation19_spill]] %s1906_s16 }
   0x5   :  { %21 = vsyncpa [#allocation3], 0 }
   0x6   :  { %22 = vsyncpa [#allocation4], 0 }
   0x7   :  { %24 = vsyncpa [#allocation4 + $0x1], 0  ;;  %s1673_s21 = smov 0   ;;  %s1675_s22 = smov 0  }
   0x8   :  { %s1677_s23 = smov 0   ;;  %s1679_s24 = smov 0  }
   0x9   :  { %s1681_s25 = smov 0   ;;  %s1683_s26 = smov 0  }
   0xa LB: > { %1921 = sst [smem:[#allocation8_spill]] %s1552_s21  ;;  %s1244_s27 = sadd.s32 4294967295, %s1572_s26   ;;  %s1572_s26 = sphi %s1683_s26, %s30_s26   ;;  %s1568_s25 = sphi %s1681_s25, %s1943_s25   ;;  %s1564_s24 = sphi %s1679_s24, %s1942_s24   ;;  %s1560_s23 = sphi %s1677_s23, %s1941_s23   ;;  %s1556_s22 = sphi %s1675_s22, %s1945_s22   ;;  %s1552_s21 = sphi %s1673_s21, %s1944_s21  }
   0xb   : > { %1922 = sst [smem:[#allocation9_spill]] %s1560_s23  ;;  %s1245_s28 = sadd.s32 4294967294, %s1572_s26  }
   0xc   : > { %1923 = sst [smem:[#allocation10_spill]] %s1568_s25  ;;  %s42_s29 = sadd.s32 1, %s1568_s25 }
   0xd   : > { %1924 = sst [smem:[#allocation11_spill]] %s1572_s26  ;;  %s399_s30 = sadd.s32 1, %s1560_s23 }
   0xe   : > { %p44_p0 = scmp.ge.s32.totalorder %s42_s29, 2  ;;  %p409_p1 = scmp.ne.s32.totalorder %s1560_s23, %s1556_s22 }
   0xf   : > { %p410_p2 = scmp.eq.s32.totalorder %s1244_s27, 1  ;;  %p415_p3 = scmp.ne.s32.totalorder %s1556_s22, %s1552_s21 }
  0x10   : > { %s1947_s29 = smov (%p44_p0, %s42_s29), 0  ;;  %p416_p5 = scmp.eq.s32.totalorder %s1245_s28, 1 }
  0x11   : > { %1925 = sst [smem:[#allocation12_spill]] %s1947_s29  ;;  %p1713_p4 = por %p410_p2, %p409_p1 }
  0x12   : > { %s394_s17 = ssub.s32 %s1568_s25, %s1947_s29  ;;  %p1246_p6 = scmp.ge.s32.totalorder %s1572_s26, 1 }
  0x13   : > { %s1926_s0 = scalar_select %p1713_p4, 1, 0 }
  0x14   : > { %p397_p7 = scmp.eq.s32.totalorder %s394_s17, 0  ;;  %p1720_p8 = por %p416_p5, %p415_p3 }
  0x15   : > { %1927 = sst [smem:[#allocation13_spill]] %s1926_s0  ;;  %p423_p9 = scmp.lt.s32.totalorder %s1572_s26, 3 }
  0x16   : > { %s1928_s18 = scalar_select %p1720_p8, 1, 0 }
  0x17   : > { %s1726_s19 = scalar_select %p397_p7, %s1560_s23, %s399_s30  }
  0x18   : > { %1929 = sst [smem:[#allocation14_spill]] %s1928_s18  ;;  %p424_p10 = pnand %p1246_p6, %p423_p9 }
  0x19   : > { %1930 = sst [smem:[#allocation15_spill]] %s1726_s19  ;;  %p1364_p11 = scmp.eq.s32.totalorder %s1244_s27, 0 }
  0x1a   : > { %s1931_s10 = sld [smem:[#allocation17_spill]]  ;;  %p1356_p12 = pneg %p424_p10 }
  0x1b   : > { %s1574_s0 = smov [#allocation2]   ;;  %s1575_s17 = smov 64  }
  0x1c   : > { %s460_s28 = sshll.u32 %s1574_s0, 4  ;;  %p1357_p13 = pnand %p1364_p11, %p1356_p12  ;;  %s461_s28 = int_to_ptr.vmem [resolvable:$true] %s460_s28 }
  0x1d   : > { %s1576_s29 = smov 4   ;;  %508 = sbr.rel (%p424_p10) target bundleno = 1894 (0x766), region = 84 }
  0x20   : > { %s458_s15 = sshll.u32 %s1931_s10, 4  ;;  %s459_s15 = int_to_ptr.hbm [resolvable:$true] %s458_s15 }
  0x21   : > { %1359 = dma.hbm_to_vmem [thread:$0]  (!%p1357_p13), %s459_s15, 256, %s461_s28, [#allocation3], %s1575_s17, %s1575_s17, %s1576_s29  }
  0x22   : > { %1543 = dma.done.wait (%p1364_p11), [#allocation3], 256  }
  0x23   : > { %1545 = vsyncadd (%p1364_p11), [#allocation3], 4294967040  ;;  %p565_p0 = scmp.lt.s32.totalorder %s1564_s24, 1  ;;  %s1932_s0 = sld [smem:[#allocation16_spill]]  ;;  %v1337_v0 = vld [vmem:[%s1894_s4 + $0x8] sm:$0xff]  ;;  %v1336_v2 = vld [vmem:[%s1894_s4] sm:$0xff] }
  0x24   : > { %v1335_v1 = vld [vmem:[%s1892_s2 + $0x8] sm:$0xff]  ;;  %v1334_v3 = vld [vmem:[%s1892_s2] sm:$0xff]  ;;  %648 = vmatpush.bf16.msra.mxu1 %v1337_v0  ;;  %vm600_vm0 = vcmask 261120   ;;  %vm656_vm1 = vcmask 64512   ;;  %s1578_s18 = smov 120   ;;  %s1579_s19 = smov 104  }
  0x25   : > { %s566_s27 = scalar_select %p565_p0, %s1564_s24, 1  ;;  %610 = vmatpush.bf16.msra.mxu0 %v1335_v1  ;;  %v1429_v8 = vld [vmem:[%s1895_s5] ss:$0 sm:$0xff]  ;;  %vm696_vm2 = vcmask 1043456   ;;  %vm897_vm3 = vcmask 130048   ;;  %vm899_vm4 = vcmask 195584  }
  0x26   : > { %v1430_v9 = vld [vmem:[%s1893_s3] ss:$0 sm:$0xff]  ;;  %s1581_s21 = smov 88   ;;  %s1584_s15 = smov 8  }
  0x27   : > { %s1252_s30 = sshll.u32 %s566_s27, 3  ;;  %s1585_s29 = smov 16  }
  0x28   : > { %s575_s20 = scalar_lea.vmem %s1891_s1, %s1252_s30  ;;  %649 = vmatpush.bf16.msra.mxu1 %v1336_v2  ;;  %s1586_s28 = smov 24  }
  0x29   : > { %s571_s23 = scalar_lea.vmem %s1932_s0, %s1252_s30  ;;  %v578_v4 = vld [vmem:[%s575_s20] sm:$0xff]  ;;  %611 = vmatpush.bf16.msra.mxu0 %v1334_v3  ;;  %s1580_s30 = smov 96  }
  0x2a   : > { %v1751_v5 = vld [vmem:[%s571_s23] sm:$0xff]  ;;  %v618_v6 = vpack.c.bf16 %v578_v4, %v578_v4  ;;  %s1577_s23 = smov 112   ;;  %s1582_s20 = smov 80  }
  0x2b   : > { %v579_v7 = vpack.c.bf16 %v1751_v5, %v1751_v5  ;;  %s1583_s0 = smov 72   ;;  %s1331_s17 = sshll.u32 %s1564_s24, 3 }
  0x2c   : > { %1271 = vmatmul.msk.bf16.vlgmr.msra.gmra.mxu1 %vm600_vm0, %v618_v6  ;;  %s1933_s26 = sld [smem:[#allocation19_spill]] }
  0x2d   : > { %1262 = vmatmul.msk.bf16.vlgmr.msra.gmra.mxu0 %vm600_vm0, %v579_v7 }
  0xa9   : > { %v651_v10 = vpop.f32.mrf.mxu1 }
  0xaa   : > { %v613_v11 = vpop.f32.mrf.mxu0  ;;  %v652_v12 = vadd.f32 %v1429_v8, %v651_v10 }
  0xab   : > { %v614_v13 = vadd.f32 %v1430_v9, %v613_v11 }
  0xac   : > { %v655_v14 = vpack.c.bf16 %v652_v12, %v652_v12 }
  0xad   : > { %v617_v15 = vpack.c.bf16 %v614_v13, %v614_v13 }
  0xae   : > { %v689_v16 = vunpack.c.l.b16 %v655_v14  ;;  %v661_v18 = vsel %vm656_vm1, %v655_v14, 0 }
  0xaf   : > { %v714_v17 = vunpack.c.l.b16 %v617_v15  ;;  %670 = vmatpush.bf16.xpose.msra.mxu2 %v661_v18 }
  0xb0   : > { %v690_v19 = vpack.c.b16 %v689_v16, %v689_v16 }
  0xb1   : > { %v715_v20 = vpack.c.b16 %v714_v17, %v714_v17  ;;  %v653_v21 = vpop.f32.mrf.mxu1 }
  0xb2   : > { %v615_v22 = vpop.f32.mrf.mxu0  ;;  %774 = vrot.lane.b32.xlu1 %v690_v19, %s1577_s23  ;;  %718 = vrot.lane.b32.xlu0 %v690_v19, %s1578_s18 }
  0xb3   : > { %772 = vrot.lane.b32.xlu2 %v715_v20, %s1577_s23  ;;  %s1144_s23 = scalar_lea.hbm %s1933_s26, %s1331_s17 }
  0xb6   : > { %1272 = vmatmul.msk.bf16.vlgmr.msra.gmra.mxu2 %vm656_vm1, %v617_v15 }
  0xba   : > { %830 = vrot.lane.b32.xlu1 %v690_v19, %s1579_s19  ;;  %716 = vrot.lane.b32.xlu0 %v715_v20, %s1578_s18  ;;  %s1934_s18 = smov %s1933_s26 }
  0xbb   : > { %828 = vrot.lane.b32.xlu2 %v715_v20, %s1579_s19 }
 0x10d   : > { %v773_v27 = vpop.permute.xlu2 %772 }
 0x115   : > { %v829_v33 = vpop.permute.xlu2 %828 }
 0x124   : > { %v775_v23 = vpop.permute.xlu1 %774  ;;  %v719_v24 = vpop.permute.xlu0 %718 }
 0x125   : > { %v724_v25 = vsel %vm656_vm1, %v719_v24, 0  ;;  %v780_v26 = vsel %vm656_vm1, %v775_v23, 0 }
 0x126   : > { %733 = vmatpush.bf16.xpose.msra.mxu3 %v724_v25  ;;  %789 = vmatpush.bf16.xpose.msrb.mxu1 %v780_v26 }
 0x12c   : > { %v831_v28 = vpop.permute.xlu1 %830  ;;  %v717_v29 = vpop.permute.xlu0 %716 }
 0x12d   : > { %1274 = vmatmul.msk.bf16.vlgmr.msra.gmra.mxu3 %vm656_vm1, %v717_v29  ;;  %1276 = vmatmul.msk.bf16.vlgmr.msrb.gmra.mxu1 %vm656_vm1, %v773_v27  ;;  %v836_v30 = vsel %vm656_vm1, %v831_v28, 0 }
 0x12e   : > { %845 = vmatpush.bf16.xpose.msrb.mxu3 %v836_v30 }
 0x139   : > { %v672_v31 = vpop.f32.mrf.mxu2 }
 0x13a   : > { %v676_v32 = vsel %vm656_vm1, %v672_v31, -inf }
 0x13b   : > { %677 = vmax.xlane.f32.xlu0 %v676_v32 }
 0x13d   : > { %1278 = vmatmul.msk.bf16.vlgmr.msrb.gmra.mxu3 %vm656_vm1, %v829_v33  ;;  %v1339_v33 = vld [vmem:[%s1896_s6 + $0x8] sm:$0xff] }
 0x13e   : > { %931 = vmatpush.bf16.msra.mxu1 %v1339_v33 }
 0x141   : > { %v674_v34 = vpop.f32.mrf.mxu2 }
 0x142   : > { %v1338_v34 = vld [vmem:[%s1896_s6] sm:$0xff] }
 0x143   : > { %932 = vmatpush.bf16.msra.mxu1 %v1338_v34 }
 0x1aa   : > { %v791_v35 = vpop.f32.mrf.mxu1 }
 0x1ab   : > { %v795_v36 = vsel %vm656_vm1, %v791_v35, -inf }
 0x1ac   : > { %796 = vmax.xlane.f32.xlu2 %v795_v36 }
 0x1ae   : > { %v678_v37 = vpop.xlane.xlu0 %677 }
 0x1af   : > { %v679_v38 = vsub.f32 %v672_v31, %v678_v37 }
 0x1b0   : > { %v735_v39 = vpop.f32.mrf.mxu3 }
 0x1b1   : > { %v680_v40 = vmul.f32 1.442695, %v679_v38  ;;  %v739_v41 = vsel %vm656_vm1, %v735_v39, -inf }
 0x1b2   : > { %v793_v42 = vpop.f32.mrf.mxu1  ;;  %740 = vmax.xlane.f32.xlu1 %v739_v41 }
 0x1b3   : > { %1438 = vpow2.f32 %v680_v40  ;;  %v1431_v42 = vld [vmem:[%s1897_s7] ss:$0 sm:$0xff] }
 0x1b8   : > { %v737_v43 = vpop.f32.mrf.mxu3 }
 0x1b9   : > { %v1439_v44 = vpop.eup %1438 }
 0x1ba   : > { %v682_v45 = vsel %vm656_vm1, %v1439_v44, 0.0 }
 0x1bb   : > { %683 = vadd.xlane.f32.xlu0 %v682_v45 }
 0x1c0   : > { %v847_v46 = vpop.f32.mrf.mxu3 }
 0x1c1   : > { %v851_v47 = vsel %vm656_vm1, %v847_v46, -inf }
 0x1c2   : > { %852 = vmax.xlane.f32.xlu2 %v851_v47 }
 0x1c8   : > { %v849_v48 = vpop.f32.mrf.mxu3 }
 0x1c9   : > { %v1587_v48 = vmov 32.0  }
 0x1cb   : > { %691 = vrot.lane.b32.xlu1 %v690_v19, %s1580_s30 }
 0x1cf   : > { %751 = vrot.lane.b32.xlu0 %v690_v19, %s1581_s21 }
 0x1d3   : > { %807 = vrot.lane.b32.xlu1 %v690_v19, %s1582_s20  ;;  %s1936_s20 = sld [smem:[#allocation18_spill]] }
 0x1d7   : > { %863 = vrot.lane.b32.xlu0 %v690_v19, %s1583_s0 }
 0x21f   : > { %v797_v49 = vpop.xlane.xlu2 %796 }
 0x220   : > { %v798_v52 = vsub.f32 %v791_v35, %v797_v49 }
 0x222   : > { %v799_v54 = vmul.f32 1.442695, %v798_v52 }
 0x225   : > { %v741_v50 = vpop.xlane.xlu1 %740 }
 0x226   : > { %v742_v51 = vsub.f32 %v735_v39, %v741_v50 }
 0x228   : > { %v743_v53 = vmul.f32 1.442695, %v742_v51 }
 0x22a   : > { %1440 = vpow2.f32 %v743_v53 }
 0x22b   : > { %1442 = vpow2.f32 %v799_v54 }
 0x22e   : > { %v684_v56 = vpop.xlane.xlu0 %683 }
 0x22f   : > { %1444 = vrcp.f32 %v684_v56 }
 0x230   : > { %v1441_v55 = vpop.eup %1440 }
 0x231   : > { %v745_v57 = vsel %vm656_vm1, %v1441_v55, 0.0  ;;  %v1443_v59 = vpop.eup %1442 }
 0x232   : > { %746 = vadd.xlane.f32.xlu2 %v745_v57  ;;  %v801_v63 = vsel %vm656_vm1, %v1443_v59, 0.0 }
 0x235   : > { %v853_v58 = vpop.xlane.xlu2 %852  ;;  %v1445_v62 = vpop.eup %1444 }
 0x236   : > { %v854_v60 = vsub.f32 %v847_v46, %v853_v58  ;;  %v686_v0 = vmul.f32 %v1445_v62, %v1439_v44 }
 0x238   : > { %v855_v61 = vmul.f32 1.442695, %v854_v60  ;;  %v687_v4 = vpack.c.bf16 %v686_v0, %v686_v0  ;;  %v1340_v60 = vld [vmem:[#allocation2] sm:$0xff]  ;;  %v1348_v0 = vld [vmem:[%s1902_s12 + $0x30] sm:$0xff] }
 0x23a   : > { %1446 = vpow2.f32 %v855_v61  ;;  %802 = vadd.xlane.f32.xlu2 %v801_v63  ;;  %v1349_v61 = vld [vmem:[%s1902_s12 + $0x38] sm:$0xff] }
 0x23b   : > { %1085 = vmatpush.bf16.msra.mxu3 %v1349_v61 }
 0x23d   : > { %v692_v1 = vpop.permute.xlu1 %691 }
 0x23e   : > { %v698_v2 = vsel %vm696_vm2, %v692_v1, 0 }
 0x23f   : > { %707 = vmatpush.bf16.msrb.mxu0 %v698_v2  ;;  %1086 = vmatpush.bf16.msra.mxu3 %v1348_v0  ;;  %v1347_v2 = vld [vmem:[%s1902_s12 + $0x28] sm:$0xff] }
 0x240   : > { %v1447_v3 = vpop.eup %1446 }
 0x241   : > { %v752_v6 = vpop.permute.xlu0 %751  ;;  %v857_v7 = vsel %vm656_vm1, %v1447_v3, 0.0 }
 0x242   : > { %v757_v8 = vsel %vm696_vm2, %v752_v6, 0  ;;  %858 = vadd.xlane.f32.xlu2 %v857_v7  ;;  %1273 = vmatmul.msk.bf16.vlgmr.msrb.gmra.mxu0 %vm656_vm1, %v687_v4  ;;  %v1345_v7 = vld [vmem:[%s1902_s12 + $0x18] sm:$0xff] }
 0x243   : > { %766 = vmatpush.bf16.msra.mxu0 %v757_v8  ;;  %1087 = vmatpush.bf16.msra.mxu3 %v1347_v2 }
 0x245   : > { %v808_v9 = vpop.permute.xlu1 %807 }
 0x246   : > { %v813_v10 = vsel %vm696_vm2, %v808_v9, 0 }
 0x247   : > { %822 = vmatpush.bf16.msrb.mxu2 %v813_v10  ;;  %v1344_v10 = vld [vmem:[%s1902_s12 + $0x10] sm:$0xff] }
 0x249   : > { %v864_v11 = vpop.permute.xlu0 %863 }
 0x24a   : > { %v869_v12 = vsel %vm696_vm2, %v864_v11, 0 }
 0x24b   : > { %878 = vmatpush.bf16.msrb.mxu0 %v869_v12 }
 0x2a5   : > { %v747_v13 = vpop.xlane.xlu2 %746 }
 0x2a6   : > { %1448 = vrcp.f32 %v747_v13  ;;  %v1432_v13 = vld [vmem:[%s1898_s8] ss:$0 sm:$0xff] }
 0x2ac   : > { %v1449_v14 = vpop.eup %1448 }
 0x2ad   : > { %v749_v15 = vmul.f32 %v1449_v14, %v1441_v55  ;;  %v803_v16 = vpop.xlane.xlu2 %802 }
 0x2ae   : > { %1450 = vrcp.f32 %v803_v16 }
 0x2af   : > { %v750_v17 = vpack.c.bf16 %v749_v15, %v749_v15  ;;  %v1433_v15 = vld [vmem:[%s1899_s9] ss:$0 sm:$0xff] }
 0x2b1   : > { %1275 = vmatmul.msk.bf16.vlgmr.msra.gmra.mxu0 %vm656_vm1, %v750_v17 }
 0x2b4   : > { %v1451_v18 = vpop.eup %1450 }
 0x2b5   : > { %v805_v19 = vmul.f32 %v1451_v18, %v1443_v59  ;;  %v859_v20 = vpop.xlane.xlu2 %858  ;;  %v1341_v59 = vld [vmem:[#allocation2 + $0x8] sm:$0xff] }
 0x2b6   : > { %1452 = vrcp.f32 %v859_v20  ;;  %1008 = vmatpush.bf16.msra.mxu2 %v1341_v59  ;;  %v1343_v20 = vld [vmem:[%s1902_s12 + $0x8] sm:$0xff] }
 0x2b7   : > { %v806_v21 = vpack.c.bf16 %v805_v19, %v805_v19  ;;  %1454 = vrcp.f32 %v1587_v48  ;;  %v1436_v48 = vld [vmem:[%s1904_s14] ss:$0 sm:$0xff] }
 0x2b9   : > { %1277 = vmatmul.msk.bf16.vlgmr.msrb.gmra.mxu2 %vm656_vm1, %v806_v21  ;;  %v1342_v21 = vld [vmem:[%s1902_s12] sm:$0xff] }
 0x2ba   : > { %1009 = vmatpush.bf16.msra.mxu2 %v1340_v60 }
 0x2bc   : > { %v1453_v22 = vpop.eup %1452 }
 0x2bd   : > { %v861_v23 = vmul.f32 %v1453_v22, %v1447_v3  ;;  %v1455_v49 = vpop.eup %1454  ;;  %v1346_v3 = vld [vmem:[%s1902_s12 + $0x20] sm:$0xff] }
 0x2be   : > { %v945_v50 = vmul.f32 32.0, %v1455_v49  ;;  %vm949_vm5 = vweird.f32 %v1455_v49  ;;  %1088 = vmatpush.bf16.msra.mxu3 %v1346_v3  ;;  %v1434_v22 = vld [vmem:[%s1901_s11] ss:$0 sm:$0xff] }
 0x2bf   : > { %v862_v24 = vpack.c.bf16 %v861_v23, %v861_v23  ;;  %v709_v25 = vpop.f32.mrf.mxu0 }
 0x2c0   : > { %v946_v51 = vsub.f32 1.0, %v945_v50 }
 0x2c1   : > { %1279 = vmatmul.msk.bf16.vlgmr.msrb.gmra.mxu0 %vm656_vm1, %v862_v24 }
 0x2c2   : > { %v947_v52 = vmul.f32 %v1455_v49, %v946_v51  ;;  %1089 = vmatpush.bf16.msra.mxu3 %v1345_v7  ;;  %v1437_v51 = vld [vmem:[%s1936_s20] ss:$0 sm:$0xff] }
 0x2c4   : > { %v948_v53 = vadd.f32 %v1455_v49, %v947_v52 }
 0x2c6   : > { %v1800_v54 = vsel %vm949_vm5, %v1455_v49, %v948_v53  ;;  %1090 = vmatpush.bf16.msra.mxu3 %v1344_v10 }
 0x2c7   : > { %v711_v26 = vpop.f32.mrf.mxu0 }
 0x2ca   : > { %1091 = vmatpush.bf16.msra.mxu3 %v1343_v20 }
 0x2ce   : > { %1092 = vmatpush.bf16.msra.mxu3 %v1342_v21 }
 0x32e   : > { %v768_v27 = vpop.f32.mrf.mxu0 }
 0x32f   : > { %885 = vrot.lane.b32.xlu2 %v768_v27, %s1584_s15  ;;  %s1148_s15 = sshll.u32 %s1144_s23, 4  ;;  %s1149_s15 = int_to_ptr.hbm [resolvable:$true] %s1148_s15 }
 0x330   : > { %s1504_s10 = sshra.s32 %s1149_s15, 4  ;;  %s1505_s10 = int_to_ptr.hbm [resolvable:$true] %s1504_s10 }
 0x331   : > { %s1506_s17 = scalar_lea.hbm %s1505_s10, 8  ;;  %p1511_p5 = scmp.lt.s32.totalorder %s1505_s10, %s1934_s18 }
 0x332   : > { %p1507_p1 = scmp.ne.s32.totalorder %s1505_s10, %s1506_s17 }
 0x334   : > { %p1508_p2 = pnand %p1507_p1, %p1713_p4 }
 0x336   : > { %v770_v28 = vpop.f32.mrf.mxu0  ;;  %p1509_p3 = pneg %p1508_p2 }
 0x337   : > { %v1435_v28 = vld [vmem:[%s1903_s13] ss:$0 sm:$0xff] }
 0x33c   : > { %v824_v29 = vpop.f32.mrf.mxu2 }
 0x33d   : > { %889 = vrot.lane.b32.xlu1 %v824_v29, %s1585_s29  ;;  %s562_s29 = sand.u32 1, %s1556_s22  }
 0x33e   : > { %v880_v30 = vpop.f32.mrf.mxu0  ;;  %s1133_s27 = scalar_lea.sflag [#allocation4], %s562_s29 }
 0x33f   : > { %893 = vrot.lane.b32.xlu0 %v880_v30, %s1586_s28  ;;  %s1251_s28 = sshll.u32 %s562_s29, 3 }
 0x340   : > { %s564_s0 = scalar_lea.vmem [#allocation5], %s1251_s28  ;;  %s1510_s28 = scalar_lea.hbm %s1934_s18, 16 }
 0x341   : > { %s1146_s24 = sshll.u32 %s564_s0, 4  ;;  %p1512_p6 = scmp.lt.s32.totalorder %s1510_s28, %s1506_s17  ;;  %s1147_s24 = int_to_ptr.vmem [resolvable:$true] %s1146_s24 }
 0x343   : > { %p1513_p7 = por %p1512_p6, %p1511_p5 }
 0x344   : > { %v826_v31 = vpop.f32.mrf.mxu2 }
 0x345   : > { %p1514_p9 = pnand %p1513_p7, %p1509_p3 }
 0x346   : > { %v882_v32 = vpop.f32.mrf.mxu0 }
 0x389   : > { %v886_v35 = vpop.permute.xlu2 %885 }
 0x38a   : > { %v896_v36 = vsel %vm656_vm1, %v709_v25, %v886_v35 }
 0x3af   : > { %v890_v37 = vpop.permute.xlu1 %889 }
 0x3b0   : > { %v898_v38 = vsel %vm897_vm3, %v896_v36, %v890_v37 }
 0x3b1   : > { %v894_v39 = vpop.permute.xlu0 %893 }
 0x3b2   : > { %v900_v40 = vsel %vm899_vm4, %v898_v38, %v894_v39 }
 0x3b3   : > { %v901_v41 = vpack.c.bf16 %v900_v40, %v900_v40 }
 0x3b5   : > { %1288 = vmatmul.msk.bf16.vlgmr.msra.gmra.mxu1 %vm600_vm0, %v901_v41 }
 0x432   : > { %v934_v43 = vpop.f32.mrf.mxu1 }
 0x433   : > { %v935_v44 = vadd.f32 %v1431_v42, %v934_v43 }
 0x435   : > { %v938_v45 = vadd.f32 %v935_v44, %v1751_v5 }
 0x437   : > { %v941_v46 = vsel %vm600_vm0, %v938_v45, 0.0 }
 0x438   : > { %942 = vadd.xlane.f32.xlu1 %v941_v46 }
 0x43a   : > { %v936_v47 = vpop.f32.mrf.mxu1 }
 0x4ab   : > { %v943_v55 = vpop.xlane.xlu1 %942 }
 0x4ac   : > { %v951_v56 = vmul.f32 %v1800_v54, %v943_v55 }
 0x4ae   : > { %v952_v57 = vsub.f32 %v938_v45, %v951_v56 }
 0x4b0   : > { %v953_v58 = vmul.f32 %v952_v57, %v952_v57 }
 0x4b2   : > { %v954_v5 = vsel %vm600_vm0, %v953_v58, 0.0 }
 0x4b3   : > { %955 = vadd.xlane.f32.xlu0 %v954_v5 }
 0x526   : > { %v956_v62 = vpop.xlane.xlu0 %955 }
 0x527   : > { %v957_v63 = vmul.f32 %v956_v62, %v1800_v54 }
 0x529   : > { %v958_v1 = vadd.f32 1e-05, %v957_v63 }
 0x52b   : > { %1456 = vrsqrt.f32 %v958_v1  ;;  %vm965_vm7 = vweird.f32 %v958_v1 }
 0x531   : > { %v1457_v4 = vpop.eup %1456 }
 0x532   : > { %v960_v6 = vmul.f32 %v1457_v4, %v958_v1  ;;  %vm966_vm6 = vweird.f32 %v1457_v4 }
 0x533   : > { %vm967_vm8 = vmor %vm965_vm7, %vm966_vm6 }
 0x534   : > { %v961_v8 = vmul.f32 %v1457_v4, %v960_v6 }
 0x536   : > { %v962_v9 = vmul.f32 0.5, %v961_v8 }
 0x538   : > { %v963_v11 = vsub.f32 1.5, %v962_v9 }
 0x53a   : > { %v964_v12 = vmul.f32 %v1457_v4, %v963_v11 }
 0x53c   : > { %v968_v14 = vsel %vm967_vm8, %v1457_v4, %v964_v12 }
 0x53d   : > { %v969_v16 = vmul.f32 %v968_v14, %v952_v57 }
 0x53f   : > { %v973_v17 = vmul.f32 %v1432_v13, %v969_v16 }
 0x541   : > { %v977_v18 = vadd.f32 %v1433_v15, %v973_v17 }
 0x543   : > { %v978_v19 = vpack.c.bf16 %v977_v18, %v977_v18 }
 0x545   : > { %1297 = vmatmul.msk.bf16.vlgmr.msra.gmra.mxu2 %vm600_vm0, %v978_v19 }
 0x5c8   : > { %v1011_v23 = vpop.f32.mrf.mxu2 }
 0x5c9   : > { %v1012_v24 = vadd.f32 %v1434_v22, %v1011_v23 }
 0x5cb   : > { %v1015_v25 = vmax.f32 %v1012_v24, 0.0 }
 0x5cd   : > { %v1016_v26 = vpack.c.bf16 %v1015_v25, %v1015_v25 }
 0x5cf   : > { %1093 = vmatmul.bf16.vlgmr.msra.gmra.mxu3 %v1016_v26 }
 0x5d0   : > { %v1013_v27 = vpop.f32.mrf.mxu2 }
 0x652   : > { %v1094_v29 = vpop.f32.mrf.mxu3 }
 0x653   : > { %v1095_v30 = vadd.f32 %v1435_v28, %v1094_v29 }
 0x655   : > { %v1098_v31 = vadd.f32 %v1095_v30, %v977_v18 }
 0x657   : > { %v1101_v32 = vsel %vm600_vm0, %v1098_v31, 0.0 }
 0x658   : > { %1102 = vadd.xlane.f32.xlu2 %v1101_v32 }
 0x65a   : > { %v1096_v33 = vpop.f32.mrf.mxu3 }
 0x6cb   : > { %v1103_v34 = vpop.xlane.xlu2 %1102 }
 0x6cc   : > { %v1104_v35 = vmul.f32 %v1103_v34, %v1800_v54 }
 0x6ce   : > { %v1105_v36 = vsub.f32 %v1098_v31, %v1104_v35 }
 0x6d0   : > { %v1106_v37 = vmul.f32 %v1105_v36, %v1105_v36 }
 0x6d2   : > { %v1107_v38 = vsel %vm600_vm0, %v1106_v37, 0.0 }
 0x6d3   : > { %1108 = vadd.xlane.f32.xlu1 %v1107_v38 }
 0x746   : > { %v1109_v39 = vpop.xlane.xlu1 %1108 }
 0x747   : > { %v1110_v40 = vmul.f32 %v1109_v39, %v1800_v54 }
 0x749   : > { %v1111_v41 = vadd.f32 1e-05, %v1110_v40 }
 0x74b   : > { %1458 = vrsqrt.f32 %v1111_v41  ;;  %vm1118_vm10 = vweird.f32 %v1111_v41 }
 0x751   : > { %v1459_v42 = vpop.eup %1458 }
 0x752   : > { %v1113_v43 = vmul.f32 %v1459_v42, %v1111_v41  ;;  %vm1119_vm9 = vweird.f32 %v1459_v42 }
 0x753   : > { %vm1120_vm11 = vmor %vm1118_vm10, %vm1119_vm9 }
 0x754   : > { %v1114_v44 = vmul.f32 %v1459_v42, %v1113_v43 }
 0x756   : > { %v1115_v45 = vmul.f32 0.5, %v1114_v44 }
 0x758   : > { %v1116_v46 = vsub.f32 1.5, %v1115_v45 }
 0x75a   : > { %v1117_v47 = vmul.f32 %v1459_v42, %v1116_v46 }
 0x75c   : > { %v1121_v49 = vsel %vm1120_vm11, %v1459_v42, %v1117_v47 }
 0x75d   : > { %v1122_v50 = vmul.f32 %v1121_v49, %v1105_v36 }
 0x75f   : > { %v1126_v52 = vmul.f32 %v1436_v48, %v1122_v50 }
 0x761   : > { %v1130_v53 = vadd.f32 %v1437_v51, %v1126_v52 }
 0x763   : > { %1131 = vst.msk [vmem:[%s564_s0] sm:$0xff] %vm600_vm0, %v1130_v53 }
 0x764   : > { %1517 = shalt.err (!%p1514_p9)
}
 0x765   : > { %1354 = dma.vmem_to_hbm [thread:$0]  (%p1713_p4), %s1147_s24, 128, %s1149_s15, %s1133_s27  }
 0x766 PF: > { %s1937_s29 = sld [smem:[#allocation11_spill]] }
 0x767   : > { %s1938_s30 = sld [smem:[#allocation8_spill]] }
 0x76c   : > { %p1366_p10 = scmp.ge.s32.totalorder %s1937_s29, 2 }
 0x76d   : > { %s1160_s20 = sand.u32 1, %s1938_s30  }
 0x76e   : > { %p1361_p11 = pnand %p1366_p10, %p1720_p8  ;;  %s1161_s0 = scalar_lea.sflag [#allocation4], %s1160_s20 }
 0x770   : > { %p1362_p12 = pneg %p1361_p11 }
 0x772   : > { %1547 = dma.done.wait (%p1362_p12), %s1161_s0, 128  }
 0x773   : > { %1549 = vsyncadd (%p1362_p12), %s1161_s0, 4294967168  ;;  %s30_s26 = sadd.s32 1, %s1937_s29   ;;  %s1940_s10 = sld [smem:[#allocation9_spill]] }
 0x774   : > { %p27_p13 = scmp.ge.s32.totalorder %s30_s26, 4   ;;  %s1941_s23 = sld [smem:[#allocation15_spill]] }
 0x775   : > { %s1942_s24 = sld [smem:[#allocation10_spill]]  ;;  %s1944_s21 = smov %s1556_s22 }
 0x776   : > { %s1943_s25 = sld [smem:[#allocation12_spill]]  ;;  %29 = sbr.rel (!%p27_p13) target bundleno = 10 (0xa), region = 127 }
 0x779   : > { %s1945_s22 = smov %s1940_s10 }
 0x77b   :  { %1167 = vsyncpa [#allocation3], 1 }
 0x77c   :  { %1169 = vsyncpa [#allocation3 + $0x1], 1 }
 0x77d   :  { %1170 = vsyncpa [#allocation4], 1 }
 0x77e   :  { %1172 = vsyncpa [#allocation4 + $0x1], 1 }

</bundles_post_ra>
